<compile_context>
chip_gen: v7x
topology: tpu7x:2x2x1
jax: 0.10.0
libtpu: 0.0.40
codegen_flags: <defaults>
</compile_context>

<pallas_src>
import jax
import jax.numpy as jnp
from jax import lax
from jax.experimental import pallas as pl
from jax.experimental.pallas import tpu as pltpu


HINGE_MARGIN = 2.0
PAIRDIST_EPS = 1e-6  # torch.nn.PairwiseDistance default eps (added to the diff)


def _criterion_kernel(fp_ref, fg_ref, idp_ref, idg_ref, y_ref, lbl_pg_ref,
                      out_ref):
    """One batch tile per grid step.

    fp_ref/fg_ref : (tb, D)  feature blocks (any float dtype, cast to f32 here)
    idp_ref/idg_ref: (1, C)  identity logits (constant index_map -> resident)
    y_ref         : (1, tb)  hinge labels as +/-1 f32 (lane-dense row)
    lbl_pg_ref    : (2,)     class labels in SMEM
    out_ref       : (1, tb)  total loss row (lane-dense)
    """

    # ---- NLL( log_softmax(identity), label ) for p and g --------------------
    def nll_loss(id_ref, label):
        x = id_ref[...].astype(jnp.float32)                       # (1, C)
        m = jnp.max(x, axis=-1, keepdims=True)
        lse = m + jnp.log(jnp.sum(jnp.exp(x - m), axis=-1, keepdims=True))
        lsoft = x - lse                                            # log_softmax
        # gather lsoft[0, label] via lane-iota mask (dynamic lane index)
        idx = lax.broadcasted_iota(jnp.int32, x.shape, 1)
        return -jnp.sum(jnp.where(idx == label, lsoft, 0.0))       # scalar

    loss_p = nll_loss(idp_ref, lbl_pg_ref[0])
    loss_g = nll_loss(idg_ref, lbl_pg_ref[1])

    # ---- PairwiseDistance(p=2) + HingeEmbeddingLoss (reduce=False) ----------
    diff = (fp_ref[...].astype(jnp.float32)
            - fg_ref[...].astype(jnp.float32) + PAIRDIST_EPS)      # (tb, D) f32
    # Lane-dense row of squared distances: ones(1, D) . (diff*diff)^T -> (1, tb)
    ones_row = jnp.ones((1, diff.shape[-1]), dtype=jnp.float32)
    d2 = lax.dot_general(
        ones_row, diff * diff,
        dimension_numbers=(((1,), (1,)), ((), ())),
        precision=lax.Precision.HIGHEST,
        preferred_element_type=jnp.float32)                        # (1, tb)
    pair_dist = jnp.sqrt(d2)                                       # (1, tb)

    y = y_ref[...]                                                 # (1, tb) +/-1
    hing = jnp.where(y > 0.0, pair_dist,
                     jnp.maximum(0.0, HINGE_MARGIN - pair_dist))

    # ---- total ---------------------------------------------------------------
    out_ref[...] = hing + loss_p + loss_g


def criterion(feature_p, feature_g, identity_p, identity_g, target, *, tb=None):
    """target = (hinge labels (B,) of +/-1, class id for p, class id for g).

    Features / identities may be f32 or bf16 (bf16 halves the HBM->VMEM DMA
    bytes; compute is always f32 inside the kernel).
    Returns the per-pair total loss, shape (B,), f32.
    """
    B, D = feature_p.shape
    _, C = identity_p.shape

    # Batch-tile size: a single full-extent block for modest B, otherwise a
    # lane/sublane-legal multiple of 128 (keeps 2 feature inputs x 2 pipeline
    # buffers well inside scoped VMEM on v5e/v6e/v7x and enables pipelining).
    if tb is None:
        tb = B if B <= 1024 else 1024
    if tb != B:
        tb = max(128, (tb // 128) * 128)     # must be a multiple of (8, 128)
    n_tiles = pl.cdiv(B, tb)

    y_row = jnp.asarray(target[0], dtype=jnp.float32).reshape(1, B)
    labels_pg = jnp.asarray([target[1], target[2]], dtype=jnp.int32)

    grid_spec = pltpu.PrefetchScalarGridSpec(
        num_scalar_prefetch=0,
        grid=(n_tiles,),
        in_specs=[
            pl.BlockSpec((tb, D), lambda i: (i, 0)),    # feature_p tile
            pl.BlockSpec((tb, D), lambda i: (i, 0)),    # feature_g tile
            pl.BlockSpec((1, C), lambda i: (0, 0)),     # identity_p (resident)
            pl.BlockSpec((1, C), lambda i: (0, 0)),     # identity_g (resident)
            pl.BlockSpec((1, tb), lambda i: (0, i)),    # hinge labels row
            pl.BlockSpec(memory_space=pltpu.MemorySpace.SMEM),  # class labels
        ],
        out_specs=pl.BlockSpec((1, tb), lambda i: (0, i)),
    )

    out = pl.pallas_call(
        _criterion_kernel,
        out_shape=jax.ShapeDtypeStruct((1, B), jnp.float32),
        grid_spec=grid_spec,
        compiler_params=pltpu.CompilerParams(
            dimension_semantics=("parallel",)),
    )(feature_p, feature_g, identity_p, identity_g, y_row, labels_pg)

    return out[0]   # (B,) — same shape as the PyTorch total_loss


def _criterion_ref(feature_p, feature_g, identity_p, identity_g, target):
    """Pure-JAX reference matching the PyTorch forward."""
    lsoft_p = jax.nn.log_softmax(identity_p.astype(jnp.float32), axis=1)
    lsoft_g = jax.nn.log_softmax(identity_g.astype(jnp.float32), axis=1)
    diff = (feature_p.astype(jnp.float32) - feature_g.astype(jnp.float32)
            + PAIRDIST_EPS)
    pair_dist = jnp.sqrt(jnp.sum(diff * diff, axis=1))
    y = jnp.asarray(target[0], dtype=jnp.float32)
    hing = jnp.where(y == 1.0, pair_dist,
                     jnp.maximum(0.0, HINGE_MARGIN - pair_dist))
    loss_p = -lsoft_p[0, target[1]]
    loss_g = -lsoft_g[0, target[2]]
    return hing + loss_p + loss_g


if __name__ == "__main__":
    key = jax.random.PRNGKey(0)
    k1, k2, k3, k4, k5, k6 = jax.random.split(key, 6)

    # ---- small case: B=8 pairs, D=32 feature dim, C=16 identity classes -----
    B, D, C = 8, 32, 16
    feature_p = jax.random.normal(k1, (B, D), dtype=jnp.float32)
    feature_g = jax.random.normal(k2, (B, D), dtype=jnp.float32)
    identity_p = jax.random.normal(k3, (1, C), dtype=jnp.float32)
    identity_g = jax.random.normal(k4, (1, C), dtype=jnp.float32)
    hinge_labels = jnp.where(jax.random.bernoulli(k5, 0.5, (B,)), 1, -1)
    target = (hinge_labels, 3, 7)

    out = jax.block_until_ready(
        criterion(feature_p, feature_g, identity_p, identity_g, target))
    ref = _criterion_ref(feature_p, feature_g, identity_p, identity_g, target)
    assert jnp.allclose(out, ref, atol=1e-5, rtol=1e-5), (out, ref)

    # ---- larger batched case exercising the tiled (grid > 1) path -----------
    B2 = 256
    kk1, kk2, kk3 = jax.random.split(k6, 3)
    fp2 = jax.random.normal(kk1, (B2, D), dtype=jnp.float32)
    fg2 = jax.random.normal(kk2, (B2, D), dtype=jnp.float32)
    lbl2 = jnp.where(jax.random.bernoulli(kk3, 0.5, (B2,)), 1, -1)
    target2 = (lbl2, 5, 2)

    out2 = jax.block_until_ready(
        criterion(fp2, fg2, identity_p, identity_g, target2, tb=128))
    ref2 = _criterion_ref(fp2, fg2, identity_p, identity_g, target2)
    assert jnp.allclose(out2, ref2, atol=1e-5, rtol=1e-5), (out2, ref2)

    print("KERNEL_OK")
</pallas_src>

<mosaic_0001>
module attributes {stable_mosaic.version = 11 : i64} {
  func.func @_criterion_kernel(%arg0: i32, %arg1: memref<8x32xf32, #tpu.memory_space<vmem>>, %arg2: memref<8x32xf32, #tpu.memory_space<vmem>>, %arg3: memref<1x16xf32, #tpu.memory_space<vmem>>, %arg4: memref<1x16xf32, #tpu.memory_space<vmem>>, %arg5: memref<1x8xf32, #tpu.memory_space<vmem>>, %arg6: memref<2xi32, #tpu.memory_space<smem>>, %arg7: memref<1x8xf32, #tpu.memory_space<vmem>>) attributes {dimension_semantics = [#tpu.dimension_semantics<parallel>], iteration_bounds = array<i64: 1>, scalar_prefetch = 0 : i64, scratch_operands = 0 : i64, tpu.core_type = #tpu.core_type<tc>, window_params = [{transform_indices = @transform_0, window_bounds = array<i64: 8, 32>}, {transform_indices = @transform_1, window_bounds = array<i64: 8, 32>}, {pipeline_mode = #tpu.pipeline_mode<synchronous>, transform_indices = @transform_2, window_bounds = array<i64: 1, 16>}, {pipeline_mode = #tpu.pipeline_mode<synchronous>, transform_indices = @transform_3, window_bounds = array<i64: 1, 16>}, {transform_indices = @transform_4, window_bounds = array<i64: 1, 8>}, {transform_indices = @transform_5, window_bounds = array<i64: 2>}, {transform_indices = @transform_6, window_bounds = array<i64: 1, 8>}]} {
    %c0 = arith.constant 0 : index
    %0 = memref.load %arg6[%c0] : memref<2xi32, #tpu.memory_space<smem>>
    %c0_0 = arith.constant 0 : index
    %c0_1 = arith.constant 0 : index
    %1 = vector.load %arg3[%c0_0, %c0_1] : memref<1x16xf32, #tpu.memory_space<vmem>>, vector<1x16xf32>
    %cst = arith.constant dense<0xFF800000> : vector<1xf32>
    %2 = vector.multi_reduction <maximumf>, %1, %cst [1] : vector<1x16xf32> to vector<1xf32>
    %3 = vector.shape_cast %2 : vector<1xf32> to vector<1x1xf32>
    %4 = vector.broadcast %3 : vector<1x1xf32> to vector<1x16xf32>
    %5 = arith.subf %1, %4 : vector<1x16xf32>
    %6 = math.exp %5 : vector<1x16xf32>
    %cst_2 = arith.constant dense<0.000000e+00> : vector<1xf32>
    %7 = vector.multi_reduction <add>, %6, %cst_2 [1] : vector<1x16xf32> to vector<1xf32>
    %8 = vector.shape_cast %7 : vector<1xf32> to vector<1x1xf32>
    %9 = math.log %8 : vector<1x1xf32>
    %10 = arith.addf %3, %9 : vector<1x1xf32>
    %11 = vector.broadcast %10 : vector<1x1xf32> to vector<1x16xf32>
    %12 = arith.subf %1, %11 : vector<1x16xf32>
    %13 = tpu.iota {dimensions = array<i32: 1>} : vector<1x16xi32>
    %14 = vector.broadcast %0 : i32 to vector<1x16xi32>
    %15 = arith.cmpi eq, %13, %14 : vector<1x16xi32>
    %cst_3 = arith.constant 0.000000e+00 : f32
    %16 = vector.broadcast %cst_3 : f32 to vector<1x16xf32>
    %17 = arith.select %15, %12, %16 : vector<1x16xi1>, vector<1x16xf32>
    %18 = vector.shape_cast %17 : vector<1x16xf32> to vector<1x1x16xf32>
    %cst_4 = arith.constant dense<0.000000e+00> : vector<1xf32>
    %19 = vector.multi_reduction <add>, %18, %cst_4 [1, 2] : vector<1x1x16xf32> to vector<1xf32>
    %20 = vector.shape_cast %19 : vector<1xf32> to vector<1x1x1xf32>
    %21 = vector.extract %20[0, 0, 0] : f32 from vector<1x1x1xf32>
    %cst_5 = arith.constant 0.000000e+00 : f32
    %22 = arith.subf %cst_5, %21 : f32
    %c1 = arith.constant 1 : index
    %23 = memref.load %arg6[%c1] : memref<2xi32, #tpu.memory_space<smem>>
    %c0_6 = arith.constant 0 : index
    %c0_7 = arith.constant 0 : index
    %24 = vector.load %arg4[%c0_6, %c0_7] : memref<1x16xf32, #tpu.memory_space<vmem>>, vector<1x16xf32>
    %cst_8 = arith.constant dense<0xFF800000> : vector<1xf32>
    %25 = vector.multi_reduction <maximumf>, %24, %cst_8 [1] : vector<1x16xf32> to vector<1xf32>
    %26 = vector.shape_cast %25 : vector<1xf32> to vector<1x1xf32>
    %27 = vector.broadcast %26 : vector<1x1xf32> to vector<1x16xf32>
    %28 = arith.subf %24, %27 : vector<1x16xf32>
    %29 = math.exp %28 : vector<1x16xf32>
    %cst_9 = arith.constant dense<0.000000e+00> : vector<1xf32>
    %30 = vector.multi_reduction <add>, %29, %cst_9 [1] : vector<1x16xf32> to vector<1xf32>
    %31 = vector.shape_cast %30 : vector<1xf32> to vector<1x1xf32>
    %32 = math.log %31 : vector<1x1xf32>
    %33 = arith.addf %26, %32 : vector<1x1xf32>
    %34 = vector.broadcast %33 : vector<1x1xf32> to vector<1x16xf32>
    %35 = arith.subf %24, %34 : vector<1x16xf32>
    %36 = tpu.iota {dimensions = array<i32: 1>} : vector<1x16xi32>
    %37 = vector.broadcast %23 : i32 to vector<1x16xi32>
    %38 = arith.cmpi eq, %36, %37 : vector<1x16xi32>
    %cst_10 = arith.constant 0.000000e+00 : f32
    %39 = vector.broadcast %cst_10 : f32 to vector<1x16xf32>
    %40 = arith.select %38, %35, %39 : vector<1x16xi1>, vector<1x16xf32>
    %41 = vector.shape_cast %40 : vector<1x16xf32> to vector<1x1x16xf32>
    %cst_11 = arith.constant dense<0.000000e+00> : vector<1xf32>
    %42 = vector.multi_reduction <add>, %41, %cst_11 [1, 2] : vector<1x1x16xf32> to vector<1xf32>
    %43 = vector.shape_cast %42 : vector<1xf32> to vector<1x1x1xf32>
    %44 = vector.extract %43[0, 0, 0] : f32 from vector<1x1x1xf32>
    %cst_12 = arith.constant 0.000000e+00 : f32
    %45 = arith.subf %cst_12, %44 : f32
    %c0_13 = arith.constant 0 : index
    %c0_14 = arith.constant 0 : index
    %46 = vector.load %arg1[%c0_13, %c0_14] : memref<8x32xf32, #tpu.memory_space<vmem>>, vector<8x32xf32>
    %c0_15 = arith.constant 0 : index
    %c0_16 = arith.constant 0 : index
    %47 = vector.load %arg2[%c0_15, %c0_16] : memref<8x32xf32, #tpu.memory_space<vmem>>, vector<8x32xf32>
    %48 = arith.subf %46, %47 : vector<8x32xf32>
    %cst_17 = arith.constant 9.99999997E-7 : f32
    %49 = vector.broadcast %cst_17 : f32 to vector<8x32xf32>
    %50 = arith.addf %48, %49 : vector<8x32xf32>
    %cst_18 = arith.constant 1.000000e+00 : f32
    %51 = vector.broadcast %cst_18 : f32 to vector<1x32xf32>
    %52 = arith.mulf %50, %50 : vector<8x32xf32>
    %cst_19 = arith.constant dense<0.000000e+00> : vector<1x8xf32>
    %53 = tpu.matmul %51, %52, %cst_19 {dimension_numbers = #tpu.dot_dimension_numbers<[1], [1], [0], [0], [0, 0, 1, 0], [], []>, precision = #tpu.contract_precision<fp32>} : vector<1x32xf32>, vector<8x32xf32>, vector<1x8xf32> -> vector<1x8xf32>
    %54 = math.sqrt %53 : vector<1x8xf32>
    %c0_20 = arith.constant 0 : index
    %c0_21 = arith.constant 0 : index
    %55 = vector.load %arg5[%c0_20, %c0_21] : memref<1x8xf32, #tpu.memory_space<vmem>>, vector<1x8xf32>
    %cst_22 = arith.constant 0.000000e+00 : f32
    %56 = vector.broadcast %cst_22 : f32 to vector<1x8xf32>
    %57 = arith.cmpf ogt, %55, %56 : vector<1x8xf32>
    %cst_23 = arith.constant 2.000000e+00 : f32
    %58 = vector.broadcast %cst_23 : f32 to vector<1x8xf32>
    %59 = arith.subf %58, %54 : vector<1x8xf32>
    %cst_24 = arith.constant 0.000000e+00 : f32
    %60 = vector.broadcast %cst_24 : f32 to vector<1x8xf32>
    %61 = arith.maximumf %60, %59 : vector<1x8xf32>
    %62 = arith.select %57, %54, %61 : vector<1x8xi1>, vector<1x8xf32>
    %63 = vector.broadcast %22 : f32 to vector<1x8xf32>
    %64 = arith.addf %62, %63 : vector<1x8xf32>
    %65 = vector.broadcast %45 : f32 to vector<1x8xf32>
    %66 = arith.addf %64, %65 : vector<1x8xf32>
    %c0_25 = arith.constant 0 : index
    %c0_26 = arith.constant 0 : index
    %67 = vector.load %arg7[%c0_25, %c0_26] : memref<1x8xf32, #tpu.memory_space<vmem>>, vector<1x8xf32>
    tpu.vector_store %arg7[%c0_25, %c0_26], %66 {strides = array<i32>} : memref<1x8xf32, #tpu.memory_space<vmem>>, vector<1x8xf32>,
    return
  }
  func.func @transform_0(%arg0: i32) -> (i32, i32) {
    %c0_i32 = arith.constant 0 : i32
    %c0_i32_0 = arith.constant 0 : i32
    return %arg0, %c0_i32 : i32, i32
  }
  func.func @transform_1(%arg0: i32) -> (i32, i32) {
    %c0_i32 = arith.constant 0 : i32
    %c0_i32_0 = arith.constant 0 : i32
    return %arg0, %c0_i32 : i32, i32
  }
  func.func @transform_2(%arg0: i32) -> (i32, i32) {
    %c0_i32 = arith.constant 0 : i32
    %c0_i32_0 = arith.constant 0 : i32
    %c0_i32_1 = arith.constant 0 : i32
    return %c0_i32, %c0_i32_0 : i32, i32
  }
  func.func @transform_3(%arg0: i32) -> (i32, i32) {
    %c0_i32 = arith.constant 0 : i32
    %c0_i32_0 = arith.constant 0 : i32
    %c0_i32_1 = arith.constant 0 : i32
    return %c0_i32, %c0_i32_0 : i32, i32
  }
  func.func @transform_4(%arg0: i32) -> (i32, i32) {
    %c0_i32 = arith.constant 0 : i32
    %c0_i32_0 = arith.constant 0 : i32
    return %c0_i32, %arg0 : i32, i32
  }
  func.func @transform_5(%arg0: i32) -> i32 {
    %c0_i32 = arith.constant 0 : i32
    %c0_i32_0 = arith.constant 0 : i32
    return %c0_i32 : i32
  }
  func.func @transform_6(%arg0: i32) -> (i32, i32) {
    %c0_i32 = arith.constant 0 : i32
    %c0_i32_0 = arith.constant 0 : i32
    return %c0_i32, %arg0 : i32, i32
  }
}

</mosaic_0001>

<bundles_post_ra>
// kernel: tpu_custom_call.1
= control target key start
LH: loop header
LB: loop body
LE: loop exit
PB: predicated region body
PF: predicated region fallthrough
CT: control target
= control target key end

     0   :  { %11 = vsyncpa [#allocation3], 0  ;;  %s896_s0 = inlined_call_operand.hbm [shape: f32[8,32], index: 0, kind: input, shape index: {}]   ;;  %s897_s1 = inlined_call_operand.hbm [shape: f32[8,32], index: 1, kind: input, shape index: {}]   ;;  %s898_s2 = inlined_call_operand.vmem [shape: f32[1,16], index: 2, kind: input, shape index: {}]   ;;  %s899_s3 = inlined_call_operand.vmem [shape: f32[1,16], index: 3, kind: input, shape index: {}]   ;;  %s900_s4 = inlined_call_operand.vmem [shape: f32[1,8], index: 4, kind: input, shape index: {}]   ;;  %s901_s5 = inlined_call_operand.vmem [shape: s32[2], index: 5, kind: input, shape index: {}]   ;;  %s902_s6 = inlined_call_operand.hbm [shape: f32[1,8], index: 6, kind: output, shape index: {}]  }
   0x1   :  { %12 = vsyncpa [#allocation7], 0 }
   0x2   :  { %13 = vsyncpa [#allocation5], 0 }
   0x3   :  { %14 = vsyncpa [#allocation4], 0  ;;  %s778_s21 = smov [#allocation2]   ;;  %s779_s23 = smov [#allocation6]  }
   0x4   :  { %s21_s22 = sshll.u32 %s778_s21, 4  ;;  %s31_s24 = sshll.u32 %s779_s23, 4  ;;  %s22_s22 = int_to_ptr.vmem [resolvable:$true] %s21_s22  ;;  %s32_s24 = int_to_ptr.vmem [resolvable:$true] %s31_s24 }
   0x5   :  { %s692_s27 = scalar_lea.hbm %s896_s0, 128 }
   0x6   :  { %p693_p0 = scmp.ne.s32.totalorder %s896_s0, %s692_s27  ;;  %p696_p1 = scmp.lt.u32.totalorder %s692_s27, %s896_s0 }
   0x8   :  { %p698_p2 = pnand %p696_p1, %p693_p0 }
   0xa   :  { %701 = shalt.err (!%p698_p2)
}
   0xb   :  { %s702_s8 = scalar_lea.vmem %s22_s22, 128  ;;  %p707_p4 = scmp.lt.s32.totalorder %s22_s22, %s22_s22 }
   0xc   :  { %p703_p3 = scmp.ne.s32.totalorder %s22_s22, %s702_s8  ;;  %p708_p5 = scmp.lt.s32.totalorder %s702_s8, %s702_s8 }
   0xe   :  { %p709_p6 = por %p708_p5, %p707_p4 }
  0x10   :  { %p710_p7 = pnand %p709_p6, %p703_p3 }
  0x12   :  { %713 = shalt.err (!%p710_p7)
}
  0x13   :  { %24 = dma.hbm_to_vmem [thread:$0]  %s896_s0, 128, %s22_s22, [#allocation3]  }
  0x14   :  { %s714_s13 = scalar_lea.hbm %s897_s1, 128 }
  0x15   :  { %p715_p8 = scmp.ne.s32.totalorder %s897_s1, %s714_s13  ;;  %p718_p9 = scmp.lt.u32.totalorder %s714_s13, %s897_s1 }
  0x17   :  { %p720_p10 = pnand %p718_p9, %p715_p8 }
  0x19   :  { %723 = shalt.err (!%p720_p10)
}
  0x1a   :  { %s724_s18 = scalar_lea.vmem %s32_s24, 128  ;;  %p729_p12 = scmp.lt.s32.totalorder %s32_s24, %s32_s24 }
  0x1b   :  { %p725_p11 = scmp.ne.s32.totalorder %s32_s24, %s724_s18  ;;  %p730_p13 = scmp.lt.s32.totalorder %s724_s18, %s724_s18 }
  0x1d   :  { %p731_p0 = por %p730_p13, %p729_p12 }
  0x1f   :  { %p732_p1 = pnand %p731_p0, %p725_p11 }
  0x21   :  { %735 = shalt.err (!%p732_p1)
}
  0x22   :  { %34 = dma.hbm_to_vmem [thread:$0]  %s897_s1, 128, %s32_s24, [#allocation7]  }
  0x23   :  { %s47_s22 = sshll.u32 %s901_s5, 4  ;;  %s48_s22 = int_to_ptr.vmem [resolvable:$true] %s47_s22 }
  0x24   :  { %s736_s23 = scalar_lea.vmem %s48_s22, 16  ;;  %p741_p3 = scmp.lt.s32.totalorder %s48_s22, %s48_s22 }
  0x25   :  { %p737_p2 = scmp.ne.s32.totalorder %s48_s22, %s736_s23  ;;  %p742_p4 = scmp.lt.s32.totalorder %s736_s23, %s736_s23 }
  0x27   :  { %p743_p5 = por %p742_p4, %p741_p3 }
  0x29   :  { %p744_p6 = pnand %p743_p5, %p737_p2 }
  0x2b   :  { %747 = shalt.err (!%p744_p6)
}
  0x2c   :  { %s780_s25 = smov [#allocation8]  }
  0x2d   :  { %50 = dma.vmem_to_smem %s48_s22, 16, %s780_s25, [#allocation5]  }
  0x2e   :  { %770 = dma.done.wait [#allocation3], 128  }
  0x2f   :  { %771 = vsyncadd [#allocation3], 4294967168 }
  0x30   :  { %772 = dma.done.wait [#allocation7], 128  }
  0x31   :  { %773 = vsyncadd [#allocation7], 4294967168 }
  0x32   :  { %774 = dma.done.wait [#allocation5], 16  }
  0x33   :  { %775 = vsyncadd [#allocation5], 4294967280 }
  0x34   :  { %60 = sfence }
  0x35   :  { %v851_v0 = vld [vmem:[%s898_s2] sm:$0x1]  ;;  %vm63_vm0 = vcmask 122880   ;;  %v123_v5 = vld [vmem:[#allocation6] sm:$0xff]  ;;  %vm127_vm1 = vcmask 261120   ;;  %v781_v6 = vmov 0.0   ;;  %v77_v35 = vlaneseq }
  0x36   :  { %v856_v1 = vld [vmem:[%s899_s3] sm:$0x1]  ;;  %v64_v2 = vsel %vm63_vm0, %v851_v0, -inf  ;;  %631 = vmatprep.subr.mxu1 %v781_v6  ;;  %646 = vmatprep.subr.mxu0 %v781_v6  ;;  %v782_v8 = vmov 0   ;;  %vm783_vm2 = vmmov 0   ;;  %v784_v22 = vmov 1.0  }
  0x37   :  { %65 = vmax.xlane.f32.xlu0 %v64_v2  ;;  %v95_v3 = vsel %vm63_vm0, %v856_v1, -inf  ;;  %v122_v4 = vld [vmem:[#allocation2] sm:$0xff]  ;;  %v129_v9 = vsel %vm127_vm1, 1.0, %v782_v8  ;;  %633 = vmatprep.mubr.msk.f32.mxu1 %vm783_vm2, %v781_v6  ;;  %s61_s2 = sld [smem:[#allocation8]]  ;;  %s615_s3 = sld [smem:[#allocation8 + $0x1]]  ;;  %v78_v37 = vand.u32 127, %v77_v35 }
  0x38   :  { %v124_v7 = vsub.f32 %v122_v4, %v123_v5  ;;  %648 = vmatprep.mubr.msk.f32.mxu0 %vm783_vm2, %v781_v6  ;;  %v201_v10 = vsub.f32 %v129_v9, %v129_v9  ;;  %s785_s9 = smov [#allocation9]   ;;  %vm596_vm8 = vcmask 57344  }
  0x39   :  { %s604_s10 = sshll.u32 %s785_s9, 4  ;;  %s605_s10 = int_to_ptr.vmem [resolvable:$true] %s604_s10 }
  0x3a   :  { %v125_v11 = vadd.f32 1e-06, %v124_v7  ;;  %v202_v12 = vand.u32 4294901760, %v201_v10  ;;  %s748_s11 = scalar_lea.vmem %s605_s10, 16  ;;  %s752_s12 = scalar_lea.vmem %s605_s10, 32 }
  0x3b   :  { %96 = vmax.xlane.f32.xlu0 %v95_v3  ;;  %p749_p7 = scmp.ne.s32.totalorder %s605_s10, %s748_s11  ;;  %p753_p8 = scmp.lt.s32.totalorder %s605_s10, %s605_s10 }
  0x3c   :  { %v126_v13 = vmul.f32 %v125_v11, %v125_v11  ;;  %v203_v14 = vsub.f32 %v201_v10, %v202_v12  ;;  %p754_p9 = scmp.lt.s32.totalorder %s752_s12, %s748_s11 }
  0x3d   :  { %v79_v39 = vstv %s61_s2  ;;  %v108_v44 = vstv %s615_s3 }
  0x3e   :  { %v132_v15 = vsel %vm127_vm1, %v126_v13, 0  ;;  %v204_v17 = vand.u32 4294901760, %v203_v14  ;;  %vm80_vm3 = vcmp.eq.s32.totalorder %v78_v37, %v79_v39  ;;  %vm109_vm4 = vcmp.eq.s32.totalorder %v78_v37, %v108_v44  ;;  %p755_p10 = por %p754_p9, %p753_p8 }
  0x3f   :  { %v135_v16 = vand.u32 4294901760, %v132_v15 }
  0x40   :  { %p756_p11 = pnand %p755_p10, %p749_p7 }
  0x41   :  { %632 = vmatpush3.xpose.msra.mxu1 %v135_v16  ;;  %v212_v18 = vsub.f32 %v132_v15, %v135_v16  ;;  %647 = vmatpush3.xpose.msra.mxu0 %v135_v16 }
  0x42   :  { %636 = vmatprep.subr.mxu1 %v781_v6  ;;  %651 = vmatprep.subr.mxu0 %v781_v6 }
  0x43   :  { %v213_v19 = vand.u32 4294901760, %v212_v18 }
  0x44   :  { %634 = vmatmul.mubr.f32.vlgmr.msra.gmra.mrb[0].mxu1 %v204_v17  ;;  %649 = vmatmul.mubr.f32.vlgmr.msra.gmra.mrb[0].mxu0 %v202_v12  ;;  %v587_v12 = vld [vmem:[%s900_s4] sm:$0x1] }
  0x45   :  { %v214_v20 = vsub.f32 %v212_v18, %v213_v19  ;;  %652 = vmatpush3.xpose.msra.mxu0 %v213_v19  ;;  %638 = vmatprep.mubr.msk.f32.mxu1 %vm783_vm2, %v781_v6  ;;  %vm588_vm7 = vcmp.gt.f32.partialorder %v587_v12, 0.0 }
  0x46   :  { %653 = vmatprep.mubr.msk.f32.mxu0 %vm783_vm2, %v781_v6  ;;  %656 = vmatprep.subr.mxu0 %v781_v6 }
  0x47   :  { %v215_v21 = vand.u32 4294901760, %v214_v20 }
  0x49   :  { %637 = vmatpush3.xpose.msra.mxu1 %v215_v21 }
  0x4a   :  { %641 = vmatprep.subr.mxu1 %v781_v6 }
  0x4c   :  { %639 = vmatmul.mubr.msk.f32.vlgmr.msra.gmra.mrb[0].mxu1 %vm127_vm1, %v784_v22  ;;  %654 = vmatmul.mubr.msk.f32.vlgmr.msra.gmra.mrb[0].mxu0 %vm127_vm1, %v784_v22 }
  0x4d   :  { %642 = vmatpush3.xpose.msra.mxu1 %v212_v18  ;;  %657 = vmatpush3.xpose.msra.mxu0 %v135_v16 }
  0x4e   :  { %643 = vmatprep.mubr.msk.f32.mxu1 %vm783_vm2, %v781_v6  ;;  %658 = vmatprep.mubr.msk.f32.mxu0 %vm783_vm2, %v781_v6 }
  0x54   :  { %644 = vmatmul.mubr.f32.vlgmr.msra.gmra.mrb[0].mxu1 %v201_v10  ;;  %659 = vmatmul.mubr.msk.f32.vlgmr.msra.gmra.mrb[0].mxu0 %vm127_vm1, %v784_v22 }
  0xc4   :  { %v66_v23 = vpop.xlane.xlu0 %65 }
  0xc5   :  { %v67_v24 = vsub.f32 %v851_v0, %v66_v23 }
  0xc7   :  { %v68_v25 = vmul.f32 1.442695, %v67_v24 }
  0xc8   :  { %v97_v26 = vpop.xlane.xlu0 %96 }
  0xc9   :  { %682 = vpow2.f32 %v68_v25  ;;  %v98_v27 = vsub.f32 %v856_v1, %v97_v26 }
  0xcb   :  { %v99_v28 = vmul.f32 1.442695, %v98_v27 }
  0xcd   :  { %684 = vpow2.f32 %v99_v28 }
  0xd3   :  { %v683_v29 = vpop.eup %682 }
  0xd4   :  { %v70_v30 = vsel %vm63_vm0, %v683_v29, 0.0 }
  0xd5   :  { %71 = vadd.xlane.f32.xlu1 %v70_v30 }
  0xd7   :  { %v685_v31 = vpop.eup %684 }
  0xd8   :  { %v101_v32 = vsel %vm63_vm0, %v685_v31, 0.0 }
  0xd9   :  { %102 = vadd.xlane.f32.xlu1 %v101_v32 }
 0x127   :  { %v356_v51 = vpop.f32.mrb[0].mxu1  ;;  %v576_v52 = vpop.f32.mrb[0].mxu0 }
 0x128   :  { %v661_v53 = vadd.f32 %v576_v52, %v356_v51  ;;  %v645_v54 = vpop.f32.mrb[1].mxu1  ;;  %v660_v55 = vpop.f32.mrb[1].mxu0 }
 0x12a   :  { %vm582_vm5 = vcmp.eq.f32.partialorder %v661_v53, inf  ;;  %v585_v8 = vand.u32 2147483648, %v661_v53  ;;  %vm584_vm6 = vcmp.eq.f32.partialorder %v661_v53, 0.0 }
 0x162   :  { %v72_v33 = vpop.xlane.xlu1 %71 }
 0x163   :  { %686 = vlog2.f32 %v72_v33 }
 0x166   :  { %v103_v34 = vpop.xlane.xlu1 %102 }
 0x167   :  { %688 = vlog2.f32 %v103_v34 }
 0x168   :  { %690 = vrsqrt.f32 %v661_v53 }
 0x16d   :  { %v687_v36 = vpop.eup %686 }
 0x16e   :  { %v74_v38 = vmul.f32 0.6931472, %v687_v36 }
 0x170   :  { %v75_v40 = vadd.f32 %v74_v38, %v66_v23 }
 0x171   :  { %v689_v41 = vpop.eup %688 }
 0x172   :  { %v105_v42 = vmul.f32 0.6931472, %v689_v41  ;;  %v76_v43 = vsub.f32 %v851_v0, %v75_v40  ;;  %v691_v6 = vpop.eup %690 }
 0x173   :  { %v581_v7 = vmul.f32 %v691_v6, %v661_v53 }
 0x174   :  { %v106_v45 = vadd.f32 %v105_v42, %v97_v26  ;;  %v81_v46 = vsel %vm80_vm3, %v76_v43, 0.0 }
 0x175   :  { %v82_v47 = vsel %vm63_vm0, %v81_v46, 0.0  ;;  %v583_v9 = vsel %vm582_vm5, %v661_v53, %v581_v7 }
 0x176   :  { %83 = vadd.xlane.f32.xlu0 %v82_v47  ;;  %v107_v48 = vsub.f32 %v856_v1, %v106_v45  ;;  %v586_v10 = vsel %vm584_vm6, %v585_v8, %v583_v9 }
 0x177   :  { %v589_v11 = vsub.f32 2.0, %v586_v10 }
 0x178   :  { %v110_v49 = vsel %vm109_vm4, %v107_v48, 0.0 }
 0x179   :  { %v111_v50 = vsel %vm63_vm0, %v110_v49, 0.0  ;;  %v590_v13 = vmax.f32 %v589_v11, 0.0 }
 0x17a   :  { %112 = vadd.xlane.f32.xlu1 %v111_v50 }
 0x17b   :  { %v591_v15 = vsel %vm588_vm7, %v586_v10, %v590_v13 }
 0x203   :  { %v84_v56 = vpop.xlane.xlu0 %83 }
 0x204   :  { %v85_v57 = vrot.slane %v84_v56, 4 }
 0x206   :  { %v86_v58 = vadd.f32 %v85_v57, %v84_v56 }
 0x207   :  { %v113_v59 = vpop.xlane.xlu1 %112 }
 0x208   :  { %v87_v60 = vrot.slane %v86_v58, 2  ;;  %v114_v61 = vrot.slane %v113_v59, 4 }
 0x20a   :  { %v115_v62 = vadd.f32 %v114_v61, %v113_v59  ;;  %v88_v63 = vadd.f32 %v87_v60, %v86_v58 }
 0x20c   :  { %v116_v0 = vrot.slane %v115_v62, 2  ;;  %v89_v2 = vrot.slane %v88_v63, 1 }
 0x20e   :  { %v117_v1 = vadd.f32 %v116_v0, %v115_v62  ;;  %v90_v3 = vadd.f32 %v89_v2, %v88_v63 }
 0x210   :  { %670 = vpush %v90_v3  ;;  %v118_v4 = vrot.slane %v117_v1, 1 }
 0x212   :  { %v119_v5 = vadd.f32 %v118_v4, %v117_v1 }
 0x214   :  { %672 = vpush %v119_v5 }
 0x241   :  { %s671_s29 = spop %670 }
 0x242   :  { %s92_s30 = ssub.f32 0.0, %s671_s29 }
 0x244   :  { %v592_v14 = vstv %s92_s30 }
 0x245   :  { %s673_s7 = spop %672  ;;  %v593_v16 = vadd.f32 %v592_v14, %v591_v15 }
 0x246   :  { %s121_s8 = ssub.f32 0.0, %s673_s7 }
 0x248   :  { %v594_v17 = vstv %s121_s8 }
 0x249   :  { %v595_v18 = vadd.f32 %v594_v17, %v593_v16 }
 0x24b   :  { %597 = vst.msk [vmem:[#allocation9] sm:$0x1] %vm596_vm8, %v595_v18 }
 0x24c   :  { %759 = shalt.err (!%p756_p11)
}
 0x24d   :  { %s760_s14 = scalar_lea.hbm %s902_s6, 16 }
 0x24e   :  { %p761_p12 = scmp.ne.s32.totalorder %s902_s6, %s760_s14  ;;  %p764_p13 = scmp.lt.u32.totalorder %s760_s14, %s902_s6 }
 0x250   :  { %p766_p0 = pnand %p764_p13, %p761_p12 }
 0x252   :  { %769 = shalt.err (!%p766_p0)
}
 0x253   :  { %607 = dma.vmem_to_hbm [thread:$0]  %s605_s10, 16, %s902_s6, [#allocation4]  }
 0x254   :  { %776 = dma.done.wait [#allocation4], 16  }
 0x255   :  { %777 = vsyncadd [#allocation4], 4294967280 }
 0x256   :  { %611 = vsyncpa [#allocation3], 1 }
 0x257   :  { %612 = vsyncpa [#allocation7], 1 }
 0x258   :  { %613 = vsyncpa [#allocation4], 1 }
 0x259   :  { %614 = vsyncpa [#allocation5], 1 }

</bundles_post_ra>
